<compile_context>
chip_gen: v7x
topology: tpu7x:2x2x1
jax: 0.10.0
libtpu: 0.0.40
codegen_flags: <defaults>
</compile_context>

<pallas_src>
import functools

import jax
import jax.numpy as jnp
from jax.experimental import pallas as pl
from jax.experimental.pallas import tpu as pltpu

_NEG_INF = -1e30  # bias for padded output columns -> exp() underflows to 0 in f32


def _round_up(n, m):
    return ((n + m - 1) // m) * m


def _num_tensorcores():
    """Best-effort TensorCore count per device (v7x: 2, v5e/v6e: 1)."""
    try:
        return max(1, int(getattr(jax.devices()[0], "num_cores", 1)))
    except Exception:  # pragma: no cover - defensive; heuristic only
        return 1


def _mlp_kernel(x_ref,
                w0_ref, b0_ref,
                w1_ref, b1_ref,
                w2_ref, b2_ref,
                w3_ref, b3_ref,
                w4_ref, b4_ref,
                o_ref):
    """Whole MLP hot path in one kernel: 5 bf16 matmuls + ReLUs + f32 softmax."""
    # x arrives f32; cast once for the MXU.
    h = x_ref[...].astype(jnp.bfloat16)

    # input_layer + ReLU          (dropout1: identity at inference)
    h = jnp.maximum(
        jnp.dot(h, w0_ref[...], preferred_element_type=jnp.float32) + b0_ref[...],
        0.0).astype(jnp.bfloat16)

    # hidden_layer_1 + ReLU       (dropout2: identity)
    h = jnp.maximum(
        jnp.dot(h, w1_ref[...], preferred_element_type=jnp.float32) + b1_ref[...],
        0.0).astype(jnp.bfloat16)

    # hidden_layer_2 + ReLU       (dropout3: identity)
    h = jnp.maximum(
        jnp.dot(h, w2_ref[...], preferred_element_type=jnp.float32) + b2_ref[...],
        0.0).astype(jnp.bfloat16)

    # hidden_layer_3 + ReLU       (dropout4: identity)
    h = jnp.maximum(
        jnp.dot(h, w3_ref[...], preferred_element_type=jnp.float32) + b3_ref[...],
        0.0).astype(jnp.bfloat16)

    # output_layer (padded 6 -> 8 classes) + softmax over the last dim.
    # Padded columns have zero weights and -1e30 bias, so exp() is exactly 0
    # there and the softmax over the real 6 classes is unchanged.
    logits = jnp.dot(h, w4_ref[...], preferred_element_type=jnp.float32) + b4_ref[...]
    m = jnp.max(logits, axis=-1, keepdims=True)
    e = jnp.exp(logits - m)
    o_ref[...] = (e / jnp.sum(e, axis=-1, keepdims=True)).astype(o_ref.dtype)


@functools.partial(jax.jit, static_argnames=("block_b",))
def network_forward(x, params, *, block_b=1024):
    """x: (B, input_size) float32. params: dict of (in,out) f32 weights & (1,out) biases."""
    B, F = x.shape
    OUT = params["w4"].shape[1]            # 6
    OUT_PAD = _round_up(OUT, 8)            # 8 -> contiguous, small output rows

    # --- batch tiling: pad the batch only to a multiple of 8 (sublane); let
    # --- Pallas handle a partial final block instead of padding to bb.
    B8 = _round_up(B, 8)
    num_cores = _num_tensorcores()
    bb = min(block_b, B8)
    if num_cores > 1 and B8 >= 16 * num_cores:
        # Multi-TensorCore chips: aim for >=2 grid steps per core so each core
        # keeps DMA/compute pipeline overlap. Single-core chips keep one big step.
        bb = min(bb, _round_up(pl.cdiv(B8, 2 * num_cores), 8))
    bb = _round_up(max(bb, 8), 8)
    grid = (pl.cdiv(B8, bb),)

    # --- operands (weights are tiny ~150 KB in bf16; no feature-dim padding).
    x_p = x.astype(jnp.float32)
    if B8 != B:
        x_p = jnp.pad(x_p, ((0, B8 - B), (0, 0)))

    w0 = params["w0"].astype(jnp.bfloat16)
    w1 = params["w1"].astype(jnp.bfloat16)
    w2 = params["w2"].astype(jnp.bfloat16)
    w3 = params["w3"].astype(jnp.bfloat16)
    w4 = jnp.pad(params["w4"], ((0, 0), (0, OUT_PAD - OUT))).astype(jnp.bfloat16)

    b0 = params["b0"].astype(jnp.float32)
    b1 = params["b1"].astype(jnp.float32)
    b2 = params["b2"].astype(jnp.float32)
    b3 = params["b3"].astype(jnp.float32)
    b4 = jnp.pad(params["b4"].astype(jnp.float32),
                 ((0, 0), (0, OUT_PAD - OUT)), constant_values=_NEG_INF)

    def replicated(arr):
        # Whole (small) array resident in VMEM; same block every grid step, so
        # Pallas fetches it once (block index never changes).
        return pl.BlockSpec(arr.shape, lambda i: (0, 0))

    in_specs = [
        pl.BlockSpec((bb, F), lambda i: (i, 0)),   # x batch tile, full feature dim
        replicated(w0), replicated(b0),
        replicated(w1), replicated(b1),
        replicated(w2), replicated(b2),
        replicated(w3), replicated(b3),
        replicated(w4), replicated(b4),
    ]
    out_specs = pl.BlockSpec((bb, OUT_PAD), lambda i: (i, 0))

    out = pl.pallas_call(
        _mlp_kernel,
        out_shape=jax.ShapeDtypeStruct((B8, OUT_PAD), jnp.float32),
        grid_spec=pltpu.PrefetchScalarGridSpec(
            num_scalar_prefetch=0,
            grid=grid,
            in_specs=in_specs,
            out_specs=out_specs,
        ),
        compiler_params=pltpu.CompilerParams(
            dimension_semantics=("parallel",),
            vmem_limit_bytes=32 * 1024 * 1024,
        ),
    )(x_p, w0, b0, w1, b1, w2, b2, w3, b3, w4, b4)

    # strip batch + class padding
    return out[:B, :OUT]


def init_params(key, input_size):
    """Deterministic synthetic parameters with the module's shapes.

    PyTorch nn.Linear stores weight as (out, in); we store the transposed
    (in, out) layout so the kernel does h @ W + b. Biases kept as (1, out).
    """
    dims = [(input_size, 256), (256, 128), (128, 128), (128, 128), (128, 6)]
    params = {}
    for idx, (fan_in, fan_out) in enumerate(dims):
        key, kw, kb = jax.random.split(key, 3)
        bound = 1.0 / jnp.sqrt(fan_in)
        params[f"w{idx}"] = jax.random.uniform(
            kw, (fan_in, fan_out), jnp.float32, -bound, bound)
        params[f"b{idx}"] = jax.random.uniform(
            kb, (1, fan_out), jnp.float32, -bound, bound)
    return params


def reference_forward(x, params):
    """Pure-JAX f32 reference of the same forward pass (eval-mode dropout)."""
    h = x
    for idx in range(4):
        h = jnp.maximum(h @ params[f"w{idx}"] + params[f"b{idx}"], 0.0)
    logits = h @ params["w4"] + params["b4"]
    return jax.nn.softmax(logits, axis=-1)


if __name__ == "__main__":
    key = jax.random.PRNGKey(0)
    key, kx, kp, kx2, kx3 = jax.random.split(key, 5)

    input_size = 32
    params = init_params(kp, input_size)

    # Case 1: small batch -> single grid step, no padding anywhere.
    x = jax.random.normal(kx, (8, input_size), jnp.float32)
    out = jax.block_until_ready(network_forward(x, params))
    ref = reference_forward(x, params)
    assert out.shape == (8, 6)
    # bf16 matmuls (f32 accumulation) vs f32 reference -> looser tolerance.
    assert jnp.allclose(out, ref, atol=3e-2), "mismatch vs reference (case 1)"
    assert jnp.allclose(jnp.sum(out, axis=-1), 1.0, atol=1e-5), "rows must sum to 1"

    # Case 2: forced small tile -> 3 grid steps with a partial final block
    # (40 rows, bb=16 -> last block has only 8 valid rows).
    x2 = jax.random.normal(kx2, (40, input_size), jnp.float32)
    out2 = jax.block_until_ready(network_forward(x2, params, block_b=16))
    ref2 = reference_forward(x2, params)
    assert out2.shape == (40, 6)
    assert jnp.allclose(out2, ref2, atol=3e-2), "mismatch vs reference (case 2)"
    assert jnp.allclose(jnp.sum(out2, axis=-1), 1.0, atol=1e-5), "rows must sum to 1"

    # Case 3: batch not a multiple of 8 -> exercises the tiny sublane pad.
    x3 = jax.random.normal(kx3, (13, input_size), jnp.float32)
    out3 = jax.block_until_ready(network_forward(x3, params))
    ref3 = reference_forward(x3, params)
    assert out3.shape == (13, 6)
    assert jnp.allclose(out3, ref3, atol=3e-2), "mismatch vs reference (case 3)"

    print("KERNEL_OK")
</pallas_src>

<mosaic_0001>
module attributes {stable_mosaic.version = 11 : i64} {
  func.func @_mlp_kernel(%arg0: i32, %arg1: memref<8x32xf32, #tpu.memory_space<vmem>>, %arg2: memref<32x256xbf16, #tpu.memory_space<vmem>>, %arg3: memref<1x256xf32, #tpu.memory_space<vmem>>, %arg4: memref<256x128xbf16, #tpu.memory_space<vmem>>, %arg5: memref<1x128xf32, #tpu.memory_space<vmem>>, %arg6: memref<128x128xbf16, #tpu.memory_space<vmem>>, %arg7: memref<1x128xf32, #tpu.memory_space<vmem>>, %arg8: memref<128x128xbf16, #tpu.memory_space<vmem>>, %arg9: memref<1x128xf32, #tpu.memory_space<vmem>>, %arg10: memref<128x8xbf16, #tpu.memory_space<vmem>>, %arg11: memref<1x8xf32, #tpu.memory_space<vmem>>, %arg12: memref<8x8xf32, #tpu.memory_space<vmem>>) attributes {dimension_semantics = [#tpu.dimension_semantics<parallel>], iteration_bounds = array<i64: 1>, scalar_prefetch = 0 : i64, scratch_operands = 0 : i64, tpu.core_type = #tpu.core_type<tc>, window_params = [{transform_indices = @transform_0, window_bounds = array<i64: 8, 32>}, {pipeline_mode = #tpu.pipeline_mode<synchronous>, transform_indices = @transform_1, window_bounds = array<i64: 32, 256>}, {pipeline_mode = #tpu.pipeline_mode<synchronous>, transform_indices = @transform_2, window_bounds = array<i64: 1, 256>}, {pipeline_mode = #tpu.pipeline_mode<synchronous>, transform_indices = @transform_3, window_bounds = array<i64: 256, 128>}, {pipeline_mode = #tpu.pipeline_mode<synchronous>, transform_indices = @transform_4, window_bounds = array<i64: 1, 128>}, {pipeline_mode = #tpu.pipeline_mode<synchronous>, transform_indices = @transform_5, window_bounds = array<i64: 128, 128>}, {pipeline_mode = #tpu.pipeline_mode<synchronous>, transform_indices = @transform_6, window_bounds = array<i64: 1, 128>}, {pipeline_mode = #tpu.pipeline_mode<synchronous>, transform_indices = @transform_7, window_bounds = array<i64: 128, 128>}, {pipeline_mode = #tpu.pipeline_mode<synchronous>, transform_indices = @transform_8, window_bounds = array<i64: 1, 128>}, {pipeline_mode = #tpu.pipeline_mode<synchronous>, transform_indices = @transform_9, window_bounds = array<i64: 128, 8>}, {pipeline_mode = #tpu.pipeline_mode<synchronous>, transform_indices = @transform_10, window_bounds = array<i64: 1, 8>}, {transform_indices = @transform_11, window_bounds = array<i64: 8, 8>}]} {
    %c0 = arith.constant 0 : index
    %c0_0 = arith.constant 0 : index
    %0 = vector.load %arg1[%c0, %c0_0] : memref<8x32xf32, #tpu.memory_space<vmem>>, vector<8x32xf32>
    %1 = arith.truncf %0 : vector<8x32xf32> to vector<8x32xbf16>
    %c0_1 = arith.constant 0 : index
    %c0_2 = arith.constant 0 : index
    %2 = vector.load %arg2[%c0_1, %c0_2] : memref<32x256xbf16, #tpu.memory_space<vmem>>, vector<32x256xbf16>
    %cst = arith.constant dense<0.000000e+00> : vector<8x256xf32>
    %3 = tpu.matmul %1, %2, %cst {dimension_numbers = #tpu.dot_dimension_numbers<[1], [0], [0], [1], [0, 0, 1, 1], [], []>} : vector<8x32xbf16>, vector<32x256xbf16>, vector<8x256xf32> -> vector<8x256xf32>
    %c0_3 = arith.constant 0 : index
    %c0_4 = arith.constant 0 : index
    %4 = vector.load %arg3[%c0_3, %c0_4] : memref<1x256xf32, #tpu.memory_space<vmem>>, vector<1x256xf32>
    %5 = vector.broadcast %4 : vector<1x256xf32> to vector<8x256xf32>
    %6 = arith.addf %3, %5 : vector<8x256xf32>
    %cst_5 = arith.constant 0.000000e+00 : f32
    %7 = vector.broadcast %cst_5 : f32 to vector<8x256xf32>
    %8 = arith.maximumf %6, %7 : vector<8x256xf32>
    %9 = arith.truncf %8 : vector<8x256xf32> to vector<8x256xbf16>
    %c0_6 = arith.constant 0 : index
    %c0_7 = arith.constant 0 : index
    %10 = vector.load %arg4[%c0_6, %c0_7] : memref<256x128xbf16, #tpu.memory_space<vmem>>, vector<256x128xbf16>
    %cst_8 = arith.constant dense<0.000000e+00> : vector<8x128xf32>
    %11 = tpu.matmul %9, %10, %cst_8 {dimension_numbers = #tpu.dot_dimension_numbers<[1], [0], [0], [1], [0, 0, 1, 1], [], []>} : vector<8x256xbf16>, vector<256x128xbf16>, vector<8x128xf32> -> vector<8x128xf32>
    %c0_9 = arith.constant 0 : index
    %c0_10 = arith.constant 0 : index
    %12 = vector.load %arg5[%c0_9, %c0_10] : memref<1x128xf32, #tpu.memory_space<vmem>>, vector<1x128xf32>
    %13 = vector.broadcast %12 : vector<1x128xf32> to vector<8x128xf32>
    %14 = arith.addf %11, %13 : vector<8x128xf32>
    %cst_11 = arith.constant 0.000000e+00 : f32
    %15 = vector.broadcast %cst_11 : f32 to vector<8x128xf32>
    %16 = arith.maximumf %14, %15 : vector<8x128xf32>
    %17 = arith.truncf %16 : vector<8x128xf32> to vector<8x128xbf16>
    %c0_12 = arith.constant 0 : index
    %c0_13 = arith.constant 0 : index
    %18 = vector.load %arg6[%c0_12, %c0_13] : memref<128x128xbf16, #tpu.memory_space<vmem>>, vector<128x128xbf16>
    %cst_14 = arith.constant dense<0.000000e+00> : vector<8x128xf32>
    %19 = tpu.matmul %17, %18, %cst_14 {dimension_numbers = #tpu.dot_dimension_numbers<[1], [0], [0], [1], [0, 0, 1, 1], [], []>} : vector<8x128xbf16>, vector<128x128xbf16>, vector<8x128xf32> -> vector<8x128xf32>
    %c0_15 = arith.constant 0 : index
    %c0_16 = arith.constant 0 : index
    %20 = vector.load %arg7[%c0_15, %c0_16] : memref<1x128xf32, #tpu.memory_space<vmem>>, vector<1x128xf32>
    %21 = vector.broadcast %20 : vector<1x128xf32> to vector<8x128xf32>
    %22 = arith.addf %19, %21 : vector<8x128xf32>
    %cst_17 = arith.constant 0.000000e+00 : f32
    %23 = vector.broadcast %cst_17 : f32 to vector<8x128xf32>
    %24 = arith.maximumf %22, %23 : vector<8x128xf32>
    %25 = arith.truncf %24 : vector<8x128xf32> to vector<8x128xbf16>
    %c0_18 = arith.constant 0 : index
    %c0_19 = arith.constant 0 : index
    %26 = vector.load %arg8[%c0_18, %c0_19] : memref<128x128xbf16, #tpu.memory_space<vmem>>, vector<128x128xbf16>
    %cst_20 = arith.constant dense<0.000000e+00> : vector<8x128xf32>
    %27 = tpu.matmul %25, %26, %cst_20 {dimension_numbers = #tpu.dot_dimension_numbers<[1], [0], [0], [1], [0, 0, 1, 1], [], []>} : vector<8x128xbf16>, vector<128x128xbf16>, vector<8x128xf32> -> vector<8x128xf32>
    %c0_21 = arith.constant 0 : index
    %c0_22 = arith.constant 0 : index
    %28 = vector.load %arg9[%c0_21, %c0_22] : memref<1x128xf32, #tpu.memory_space<vmem>>, vector<1x128xf32>
    %29 = vector.broadcast %28 : vector<1x128xf32> to vector<8x128xf32>
    %30 = arith.addf %27, %29 : vector<8x128xf32>
    %cst_23 = arith.constant 0.000000e+00 : f32
    %31 = vector.broadcast %cst_23 : f32 to vector<8x128xf32>
    %32 = arith.maximumf %30, %31 : vector<8x128xf32>
    %33 = arith.truncf %32 : vector<8x128xf32> to vector<8x128xbf16>
    %c0_24 = arith.constant 0 : index
    %c0_25 = arith.constant 0 : index
    %34 = vector.load %arg10[%c0_24, %c0_25] : memref<128x8xbf16, #tpu.memory_space<vmem>>, vector<128x8xbf16>
    %cst_26 = arith.constant dense<0.000000e+00> : vector<8x8xf32>
    %35 = tpu.matmul %33, %34, %cst_26 {dimension_numbers = #tpu.dot_dimension_numbers<[1], [0], [0], [1], [0, 0, 1, 1], [], []>} : vector<8x128xbf16>, vector<128x8xbf16>, vector<8x8xf32> -> vector<8x8xf32>
    %c0_27 = arith.constant 0 : index
    %c0_28 = arith.constant 0 : index
    %36 = vector.load %arg11[%c0_27, %c0_28] : memref<1x8xf32, #tpu.memory_space<vmem>>, vector<1x8xf32>
    %37 = vector.broadcast %36 : vector<1x8xf32> to vector<8x8xf32>
    %38 = arith.addf %35, %37 : vector<8x8xf32>
    %cst_29 = arith.constant dense<0xFF800000> : vector<8xf32>
    %39 = vector.multi_reduction <maximumf>, %38, %cst_29 [1] : vector<8x8xf32> to vector<8xf32>
    %40 = vector.shape_cast %39 : vector<8xf32> to vector<8x1xf32>
    %41 = vector.broadcast %40 : vector<8x1xf32> to vector<8x8xf32>
    %42 = arith.subf %38, %41 : vector<8x8xf32>
    %43 = math.exp %42 : vector<8x8xf32>
    %cst_30 = arith.constant dense<0.000000e+00> : vector<8xf32>
    %44 = vector.multi_reduction <add>, %43, %cst_30 [1] : vector<8x8xf32> to vector<8xf32>
    %45 = vector.shape_cast %44 : vector<8xf32> to vector<8x1xf32>
    %46 = vector.broadcast %45 : vector<8x1xf32> to vector<8x8xf32>
    %47 = arith.divf %43, %46 : vector<8x8xf32>
    %c0_31 = arith.constant 0 : index
    %c0_32 = arith.constant 0 : index
    %48 = vector.load %arg12[%c0_31, %c0_32] : memref<8x8xf32, #tpu.memory_space<vmem>>, vector<8x8xf32>
    tpu.vector_store %arg12[%c0_31, %c0_32], %47 {strides = array<i32>} : memref<8x8xf32, #tpu.memory_space<vmem>>, vector<8x8xf32>,
    return
  }
  func.func @transform_0(%arg0: i32) -> (i32, i32) {
    %c0_i32 = arith.constant 0 : i32
    %c0_i32_0 = arith.constant 0 : i32
    return %arg0, %c0_i32 : i32, i32
  }
  func.func @transform_1(%arg0: i32) -> (i32, i32) {
    %c0_i32 = arith.constant 0 : i32
    %c0_i32_0 = arith.constant 0 : i32
    %c0_i32_1 = arith.constant 0 : i32
    return %c0_i32, %c0_i32_0 : i32, i32
  }
  func.func @transform_2(%arg0: i32) -> (i32, i32) {
    %c0_i32 = arith.constant 0 : i32
    %c0_i32_0 = arith.constant 0 : i32
    %c0_i32_1 = arith.constant 0 : i32
    return %c0_i32, %c0_i32_0 : i32, i32
  }
  func.func @transform_3(%arg0: i32) -> (i32, i32) {
    %c0_i32 = arith.constant 0 : i32
    %c0_i32_0 = arith.constant 0 : i32
    %c0_i32_1 = arith.constant 0 : i32
    return %c0_i32, %c0_i32_0 : i32, i32
  }
  func.func @transform_4(%arg0: i32) -> (i32, i32) {
    %c0_i32 = arith.constant 0 : i32
    %c0_i32_0 = arith.constant 0 : i32
    %c0_i32_1 = arith.constant 0 : i32
    return %c0_i32, %c0_i32_0 : i32, i32
  }
  func.func @transform_5(%arg0: i32) -> (i32, i32) {
    %c0_i32 = arith.constant 0 : i32
    %c0_i32_0 = arith.constant 0 : i32
    %c0_i32_1 = arith.constant 0 : i32
    return %c0_i32, %c0_i32_0 : i32, i32
  }
  func.func @transform_6(%arg0: i32) -> (i32, i32) {
    %c0_i32 = arith.constant 0 : i32
    %c0_i32_0 = arith.constant 0 : i32
    %c0_i32_1 = arith.constant 0 : i32
    return %c0_i32, %c0_i32_0 : i32, i32
  }
  func.func @transform_7(%arg0: i32) -> (i32, i32) {
    %c0_i32 = arith.constant 0 : i32
    %c0_i32_0 = arith.constant 0 : i32
    %c0_i32_1 = arith.constant 0 : i32
    return %c0_i32, %c0_i32_0 : i32, i32
  }
  func.func @transform_8(%arg0: i32) -> (i32, i32) {
    %c0_i32 = arith.constant 0 : i32
    %c0_i32_0 = arith.constant 0 : i32
    %c0_i32_1 = arith.constant 0 : i32
    return %c0_i32, %c0_i32_0 : i32, i32
  }
  func.func @transform_9(%arg0: i32) -> (i32, i32) {
    %c0_i32 = arith.constant 0 : i32
    %c0_i32_0 = arith.constant 0 : i32
    %c0_i32_1 = arith.constant 0 : i32
    return %c0_i32, %c0_i32_0 : i32, i32
  }
  func.func @transform_10(%arg0: i32) -> (i32, i32) {
    %c0_i32 = arith.constant 0 : i32
    %c0_i32_0 = arith.constant 0 : i32
    %c0_i32_1 = arith.constant 0 : i32
    return %c0_i32, %c0_i32_0 : i32, i32
  }
  func.func @transform_11(%arg0: i32) -> (i32, i32) {
    %c0_i32 = arith.constant 0 : i32
    %c0_i32_0 = arith.constant 0 : i32
    return %arg0, %c0_i32 : i32, i32
  }
}

</mosaic_0001>

<bundles_post_ra>
// kernel: network_forward.1
= control target key start
LH: loop header
LB: loop body
LE: loop exit
PB: predicated region body
PF: predicated region fallthrough
CT: control target
= control target key end

     0   :  { %v904_v2 = vmov 0   ;;  %vm78_vm0 = vcmask 261120   ;;  %s1163_s0 = inlined_call_operand.vmem [shape: f32[8,32], index: 0, kind: input, shape index: {}]   ;;  %s1164_s1 = inlined_call_operand.vmem [shape: bf16[32,256], index: 1, kind: input, shape index: {}]   ;;  %s1165_s2 = inlined_call_operand.vmem [shape: f32[1,256], index: 2, kind: input, shape index: {}]   ;;  %s1166_s3 = inlined_call_operand.vmem [shape: bf16[256,128], index: 3, kind: input, shape index: {}]   ;;  %s1167_s4 = inlined_call_operand.vmem [shape: f32[1,128], index: 4, kind: input, shape index: {}]   ;;  %s1168_s5 = inlined_call_operand.vmem [shape: bf16[128,128], index: 5, kind: input, shape index: {}]   ;;  %s1169_s6 = inlined_call_operand.vmem [shape: f32[1,128], index: 6, kind: input, shape index: {}]   ;;  %s1170_s7 = inlined_call_operand.vmem [shape: bf16[128,128], index: 7, kind: input, shape index: {}]   ;;  %s1171_s8 = inlined_call_operand.vmem [shape: f32[1,128], index: 8, kind: input, shape index: {}]   ;;  %s1172_s9 = inlined_call_operand.vmem [shape: bf16[128,8], index: 9, kind: input, shape index: {}]   ;;  %s1173_s10 = inlined_call_operand.vmem [shape: f32[1,8], index: 10, kind: input, shape index: {}]   ;;  %s1174_s11 = inlined_call_operand.hbm [shape: f32[8,8], index: 11, kind: output, shape index: {}]  }
   0x1   :  { %v830_v0 = vld [vmem:[%s1164_s1 + $0x4] ss:$8 sps:$4 sm:$0xff]   ;;  %v832_v1 = vld [vmem:[%s1164_s1] ss:$8 sps:$4 sm:$0xff]   ;;  %114 = vmatprep.mubr.bf16.mxu0 %v904_v2  ;;  %v833_v3 = vld [vmem:[%s1164_s1 + $0x14] ss:$8 sps:$4 sm:$0xff]  }
   0x2   :  { %82 = vmatprep.subr.bf16.mxu0 %v830_v0  ;;  %v835_v4 = vld [vmem:[%s1164_s1 + $0x10] ss:$8 sps:$4 sm:$0xff]   ;;  %v40_v5 = vld [vmem:[%s1163_s0] sm:$0xff]  ;;  %v838_v8 = vld [vmem:[%s1166_s3 + $0x48] sm:$0xff]  }
   0x3   :  { %83 = vmatpush1.bf16.msra.mxu0 %v832_v1  ;;  %v836_v6 = vld [vmem:[%s1166_s3 + $0x40] sm:$0xff]   ;;  %v41_v9 = vpack.c.bf16 %v40_v5, %v40_v5  ;;  %v839_v10 = vld [vmem:[%s1166_s3 + $0x8] sm:$0xff]   ;;  %v840_v11 = vld [vmem:[%s1166_s3 + $0x50] sm:$0xff]  }
   0x4   :  { %84 = vmatprep.subr.bf16.mxu0 %v833_v3  ;;  %v837_v7 = vld [vmem:[%s1166_s3] sm:$0xff]   ;;  %717 = vmatprep.subr.bf16.mxu1 %v836_v6  ;;  %v841_v12 = vld [vmem:[%s1166_s3 + $0x10] sm:$0xff]   ;;  %v842_v13 = vld [vmem:[%s1166_s3 + $0x58] sm:$0xff]  }
   0x5   :  { %718 = vmatpush3.bf16.msra.mxu1 %v837_v7  ;;  %v843_v14 = vld [vmem:[%s1166_s3 + $0x18] sm:$0xff]   ;;  %v844_v15 = vld [vmem:[%s1166_s3 + $0x60] sm:$0xff]   ;;  %v846_v17 = vld [vmem:[%s1166_s3 + $0x68] sm:$0xff]  }
   0x6   :  { %719 = vmatprep.subr.bf16.mxu1 %v838_v8  ;;  %v845_v16 = vld [vmem:[%s1166_s3 + $0x20] sm:$0xff]   ;;  %v847_v18 = vld [vmem:[%s1166_s3 + $0x28] sm:$0xff]  }
   0x7   :  { %85 = vmatpush1.bf16.msra.mxu0 %v835_v4 }
   0x9   :  { %720 = vmatpush3.bf16.msra.mxu1 %v839_v10 }
   0xa   :  { %672 = vmatmul.mubr.msk.bf16.vlgmr.msra.gmra.mrb[0].mxu0 %vm78_vm0, %v41_v9  ;;  %721 = vmatprep.subr.bf16.mxu1 %v840_v11 }
   0xd   :  { %722 = vmatpush3.bf16.msra.mxu1 %v841_v12 }
   0xe   :  { %723 = vmatprep.subr.bf16.mxu1 %v842_v13 }
  0x11   :  { %724 = vmatpush3.bf16.msra.mxu1 %v843_v14 }
  0x12   :  { %725 = vmatprep.subr.bf16.mxu1 %v844_v15 }
  0x15   :  { %726 = vmatpush3.bf16.msra.mxu1 %v845_v16 }
  0x16   :  { %727 = vmatprep.subr.bf16.mxu1 %v846_v17 }
  0x19   :  { %728 = vmatpush3.bf16.msra.mxu1 %v847_v18 }
  0x1a   :  { %16 = vsyncpa [#allocation3], 0  ;;  %v848_v19 = vld [vmem:[%s1166_s3 + $0x70] sm:$0xff]   ;;  %v850_v21 = vld [vmem:[%s1166_s3 + $0x78] sm:$0xff]   ;;  %v905_v24 = vmov 0.0   ;;  %v48_v30 = vlaneseq  ;;  %vm906_vm1 = vmmov 0  }
  0x1b   :  { %v849_v20 = vld [vmem:[%s1166_s3 + $0x30] sm:$0xff]   ;;  %729 = vmatprep.subr.bf16.mxu1 %v848_v19  ;;  %v851_v22 = vld [vmem:[%s1166_s3 + $0x38] sm:$0xff]   ;;  %v852_v23 = vld [vmem:[%s1168_s5] sm:$0xff]   ;;  %766 = vmatprep.subr.bf16.mxu0 %v905_v24  ;;  %vm641_vm2 = vcmask 64512  }
  0x1c   :  { %767 = vmatpush3.bf16.msra.mxu0 %v852_v23  ;;  %v853_v25 = vld [vmem:[%s1168_s5 + $0x8] sm:$0xff]   ;;  %v854_v26 = vld [vmem:[%s1168_s5 + $0x10] sm:$0xff]   ;;  %v855_v27 = vld [vmem:[%s1168_s5 + $0x18] sm:$0xff]   ;;  %v49_v31 = vshrl.u32 %v48_v30, 7  ;;  %782 = vmatprep.mubr.msk.bf16.mxu0 %vm906_vm1, %v905_v24 }
  0x1d   :  { %730 = vmatpush3.bf16.msra.mxu1 %v849_v20  ;;  %768 = vmatprep.subr.bf16.mxu0 %v905_v24  ;;  %v856_v28 = vld [vmem:[%s1168_s5 + $0x20] sm:$0xff]   ;;  %v857_v29 = vld [vmem:[%s1168_s5 + $0x28] sm:$0xff]   ;;  %v858_v47 = vld [vmem:[%s1168_s5 + $0x30] sm:$0xff]  }
  0x1e   :  { %731 = vmatprep.subr.bf16.mxu1 %v850_v21  ;;  %v50_v32 = vsub.s32 0, %v49_v31  ;;  %v46_v33 = vld [vmem:[%s1165_s2] sm:$0x3]  ;;  %v54_v34 = vsub.s32 1, %v49_v31  ;;  %v859_v48 = vld [vmem:[%s1168_s5 + $0x38] sm:$0xff]   ;;  %v861_v50 = vld [vmem:[%s1170_s7 + $0x8] sm:$0xff]  }
  0x1f   :  { %v860_v49 = vld [vmem:[%s1170_s7] sm:$0xff]   ;;  %v862_v51 = vld [vmem:[%s1170_s7 + $0x10] sm:$0xff]   ;;  %v863_v52 = vld [vmem:[%s1170_s7 + $0x18] sm:$0xff]  }
  0x20   :  { %769 = vmatpush3.bf16.msra.mxu0 %v853_v25  ;;  %v51_v35 = vrot.slane %v46_v33, %v50_v32  ;;  %v55_v36 = vrot.slane %v46_v33, %v54_v34  ;;  %v864_v53 = vld [vmem:[%s1170_s7 + $0x20] sm:$0xff]   ;;  %v865_v54 = vld [vmem:[%s1170_s7 + $0x28] sm:$0xff]   ;;  %v866_v0 = vld [vmem:[%s1170_s7 + $0x30] sm:$0xff]  }
  0x21   :  { %732 = vmatpush3.bf16.msra.mxu1 %v851_v22  ;;  %770 = vmatprep.subr.bf16.mxu0 %v905_v24  ;;  %v673_v56 = vld [vmem:[%s1167_s4] ss:$0 sm:$0xff]  ;;  %v867_v1 = vld [vmem:[%s1170_s7 + $0x38] sm:$0xff]   ;;  %v869_v3 = vld [vmem:[%s1172_s9 + $0x8] sm:$0xff]  }
  0x22   :  { %786 = vmatprep.subr.bf16.mxu1 %v905_v24  ;;  %v868_v2 = vld [vmem:[%s1172_s9] sm:$0xff]   ;;  %v870_v4 = vld [vmem:[%s1172_s9 + $0x10] sm:$0xff]   ;;  %v871_v5 = vld [vmem:[%s1172_s9 + $0x18] sm:$0xff]  }
  0x23   :  { %v872_v6 = vld [vmem:[%s1172_s9 + $0x20] sm:$0xff]   ;;  %v873_v7 = vld [vmem:[%s1172_s9 + $0x28] sm:$0xff]   ;;  %v874_v16 = vld [vmem:[%s1172_s9 + $0x30] sm:$0xff]  }
  0x24   :  { %771 = vmatpush3.bf16.msra.mxu0 %v854_v26  ;;  %v690_v8 = vld [vmem:[%s1169_s6] ss:$0 sm:$0xff]  ;;  %v875_v17 = vld [vmem:[%s1172_s9 + $0x38] sm:$0xff]  }
  0x25   :  { %772 = vmatprep.subr.bf16.mxu0 %v905_v24  ;;  %v699_v18 = vld [vmem:[%s1171_s8] ss:$0 sm:$0xff]  ;;  %s907_s8 = smov [#allocation2]  }
  0x26   :  { %s660_s9 = sshll.u32 %s907_s8, 4  ;;  %s661_s9 = int_to_ptr.vmem [resolvable:$true] %s660_s9 }
  0x27   :  { %p885_p1 = scmp.lt.s32.totalorder %s661_s9, %s661_s9 }
  0x28   :  { %773 = vmatpush3.bf16.msra.mxu0 %v855_v27 }
  0x29   :  { %774 = vmatprep.subr.bf16.mxu0 %v905_v24 }
  0x2c   :  { %775 = vmatpush3.bf16.msra.mxu0 %v856_v28 }
  0x2d   :  { %776 = vmatprep.subr.bf16.mxu0 %v905_v24 }
  0x30   :  { %777 = vmatpush3.bf16.msra.mxu0 %v857_v29 }
  0x31   :  { %778 = vmatprep.subr.bf16.mxu0 %v905_v24 }
  0x34   :  { %779 = vmatpush3.bf16.msra.mxu0 %v858_v47 }
  0x35   :  { %780 = vmatprep.subr.bf16.mxu0 %v905_v24 }
  0x38   :  { %781 = vmatpush3.bf16.msra.mxu0 %v859_v48 }
  0x39   :  { %806 = vmatprep.subr.bf16.mxu0 %v905_v24 }
  0xdd   :  { %v116_v37 = vpop.f32.mrb[0].mxu0 }
  0xde   :  { %v117_v38 = vadd.f32 %v116_v37, %v51_v35  ;;  %v118_v39 = vpop.f32.mrb[1].mxu0 }
  0xdf   :  { %v119_v40 = vadd.f32 %v118_v39, %v55_v36  ;;  %v120_v41 = vpop.f32.mrb[2].mxu0 }
  0xe0   :  { %v123_v42 = vmax.f32 %v117_v38, 0.0  ;;  %v121_v43 = vpop.f32.mrb[3].mxu0 }
  0xe1   :  { %v124_v44 = vmax.f32 %v119_v40, 0.0 }
  0xe2   :  { %v125_v46 = vpack.c.bf16 %v123_v42, %v123_v42 }
  0xe3   :  { %v126_v45 = vpack.c.bf16 %v124_v44, %v124_v44 }
  0xe5   :  { %294 = vmatprep.mubr.bf16.mxu1 %v126_v45 }
  0xe6   :  { %295 = vmatmul.mubr.bf16.vlgmr.msra.gmra.mrb[0].mxu1 %v125_v46 }
  0xe7   :  { %802 = vmatprep.mubr.msk.bf16.mxu1 %vm906_vm1, %v905_v24  ;;  %787 = vmatpush3.bf16.msra.mxu1 %v860_v49 }
  0xe8   :  { %788 = vmatprep.subr.bf16.mxu1 %v905_v24 }
  0xeb   :  { %789 = vmatpush3.bf16.msra.mxu1 %v861_v50 }
  0xec   :  { %790 = vmatprep.subr.bf16.mxu1 %v905_v24 }
  0xef   :  { %791 = vmatpush3.bf16.msra.mxu1 %v862_v51 }
  0xf0   :  { %792 = vmatprep.subr.bf16.mxu1 %v905_v24 }
  0xf3   :  { %793 = vmatpush3.bf16.msra.mxu1 %v863_v52 }
  0xf4   :  { %794 = vmatprep.subr.bf16.mxu1 %v905_v24 }
  0xf7   :  { %795 = vmatpush3.bf16.msra.mxu1 %v864_v53 }
  0xf8   :  { %796 = vmatprep.subr.bf16.mxu1 %v905_v24 }
  0xfb   :  { %797 = vmatpush3.bf16.msra.mxu1 %v865_v54 }
  0xfc   :  { %798 = vmatprep.subr.bf16.mxu1 %v905_v24 }
  0xff   :  { %799 = vmatpush3.bf16.msra.mxu1 %v866_v0 }
 0x100   :  { %800 = vmatprep.subr.bf16.mxu1 %v905_v24 }
 0x103   :  { %801 = vmatpush3.bf16.msra.mxu1 %v867_v1 }
 0x1b9   :  { %v733_v55 = vpop.f32.mrb[0].mxu1 }
 0x1ba   :  { %v734_v57 = vpop.f32.mrb[1].mxu1 }
 0x1bb   :  { %v735_v58 = vadd.f32 %v734_v57, %v733_v55  ;;  %v736_v59 = vpop.f32.mrb[2].mxu1 }
 0x1bc   :  { %v737_v60 = vpop.f32.mrb[3].mxu1 }
 0x1bd   :  { %v297_v61 = vadd.f32 %v735_v58, %v673_v56 }
 0x1bf   :  { %v302_v62 = vmax.f32 %v297_v61, 0.0 }
 0x1c1   :  { %v303_v63 = vpack.c.bf16 %v302_v62, %v302_v62 }
 0x1c3   :  { %783 = vmatmul.mubr.bf16.vlgmr.msra.gmra.mrb[4].mxu0 %v303_v63 }
 0x1c4   :  { %822 = vmatprep.mubr.msk.bf16.mxu0 %vm906_vm1, %v905_v24  ;;  %807 = vmatpush3.bf16.msra.mxu0 %v868_v2 }
 0x1c5   :  { %808 = vmatprep.subr.bf16.mxu0 %v905_v24 }
 0x1c8   :  { %809 = vmatpush3.bf16.msra.mxu0 %v869_v3 }
 0x1c9   :  { %810 = vmatprep.subr.bf16.mxu0 %v905_v24 }
 0x1cc   :  { %811 = vmatpush3.bf16.msra.mxu0 %v870_v4 }
 0x1cd   :  { %812 = vmatprep.subr.bf16.mxu0 %v905_v24 }
 0x1d0   :  { %813 = vmatpush3.bf16.msra.mxu0 %v871_v5 }
 0x1d1   :  { %814 = vmatprep.subr.bf16.mxu0 %v905_v24 }
 0x1d4   :  { %815 = vmatpush3.bf16.msra.mxu0 %v872_v6 }
 0x1d5   :  { %816 = vmatprep.subr.bf16.mxu0 %v905_v24 }
 0x1d8   :  { %817 = vmatpush3.bf16.msra.mxu0 %v873_v7 }
 0x1d9   :  { %818 = vmatprep.subr.bf16.mxu0 %v905_v24 }
 0x1dc   :  { %819 = vmatpush3.bf16.msra.mxu0 %v874_v16 }
 0x1dd   :  { %820 = vmatprep.subr.bf16.mxu0 %v905_v24  ;;  %v708_v24 = vld [vmem:[%s1173_s10] ss:$0 sm:$0xff]  ;;  %s880_s10 = scalar_lea.vmem %s661_s9, 128 }
 0x1de   :  { %p881_p0 = scmp.ne.s32.totalorder %s661_s9, %s880_s10  ;;  %p886_p2 = scmp.lt.s32.totalorder %s880_s10, %s880_s10 }
 0x1e0   :  { %821 = vmatpush3.bf16.msra.mxu0 %v875_v17  ;;  %p887_p3 = por %p886_p2, %p885_p1 }
 0x1e2   :  { %p888_p4 = pnand %p887_p3, %p881_p0 }
 0x296   :  { %v409_v9 = vpop.f32.mrb[4].mxu0 }
 0x297   :  { %v410_v10 = vadd.f32 %v690_v8, %v409_v9  ;;  %v784_v11 = vpop.f32.mrb[5].mxu0 }
 0x298   :  { %v412_v12 = vpop.f32.mrb[6].mxu0 }
 0x299   :  { %v415_v13 = vmax.f32 %v410_v10, 0.0  ;;  %v785_v14 = vpop.f32.mrb[7].mxu0 }
 0x29b   :  { %v416_v15 = vpack.c.bf16 %v415_v13, %v415_v13 }
 0x29d   :  { %803 = vmatmul.mubr.bf16.vlgmr.msra.gmra.mrb[4].mxu1 %v416_v15 }
 0x370   :  { %v522_v19 = vpop.f32.mrb[4].mxu1 }
 0x371   :  { %v523_v20 = vadd.f32 %v699_v18, %v522_v19  ;;  %v804_v21 = vpop.f32.mrb[5].mxu1 }
 0x372   :  { %v525_v22 = vpop.f32.mrb[6].mxu1 }
 0x373   :  { %v528_v23 = vmax.f32 %v523_v20, 0.0  ;;  %v805_v25 = vpop.f32.mrb[7].mxu1 }
 0x375   :  { %v529_v26 = vpack.c.bf16 %v528_v23, %v528_v23 }
 0x377   :  { %823 = vmatmul.mubr.bf16.vlgmr.msra.gmra.mrb[8].mxu0 %v529_v26 }
 0x44a   :  { %v635_v27 = vpop.f32.mrb[8].mxu0 }
 0x44b   :  { %v636_v28 = vadd.f32 %v708_v24, %v635_v27  ;;  %v824_v29 = vpop.f32.mrb[9].mxu0 }
 0x44c   :  { %v638_v30 = vpop.f32.mrb[10].mxu0 }
 0x44d   :  { %v825_v31 = vpop.f32.mrb[11].mxu0  ;;  %v642_v32 = vsel %vm641_vm2, %v636_v28, -inf }
 0x44e   :  { %643 = vmax.xlane.f32.xlu0 %v642_v32 }
 0x4db   :  { %v644_v33 = vpop.xlane.xlu0 %643 }
 0x4dc   :  { %v645_v34 = vsub.f32 %v636_v28, %v644_v33 }
 0x4de   :  { %v646_v35 = vmul.f32 1.442695, %v645_v34 }
 0x4e0   :  { %876 = vpow2.f32 %v646_v35 }
 0x4ea   :  { %v877_v36 = vpop.eup %876 }
 0x4eb   :  { %v648_v37 = vsel %vm641_vm2, %v877_v36, 0.0 }
 0x4ec   :  { %649 = vadd.xlane.f32.xlu0 %v648_v37 }
 0x579   :  { %v650_v38 = vpop.xlane.xlu0 %649 }
 0x57a   :  { %878 = vrcp.f32 %v650_v38 }
 0x584   :  { %v879_v39 = vpop.eup %878 }
 0x585   :  { %v652_v40 = vmul.f32 %v879_v39, %v877_v36 }
 0x587   :  { %653 = vst.msk [vmem:[#allocation2] sm:$0xff] %vm641_vm2, %v652_v40 }
 0x588   :  { %891 = shalt.err (!%p888_p4)
}
 0x589   :  { %s892_s25 = scalar_lea.hbm %s1174_s11, 128 }
 0x58a   :  { %p893_p5 = scmp.ne.s32.totalorder %s1174_s11, %s892_s25  ;;  %p896_p6 = scmp.lt.u32.totalorder %s892_s25, %s1174_s11 }
 0x58c   :  { %p898_p7 = pnand %p896_p6, %p893_p5 }
 0x58e   :  { %901 = shalt.err (!%p898_p7)
}
 0x58f   :  { %663 = dma.vmem_to_hbm [thread:$0]  %s661_s9, 128, %s1174_s11, [#allocation3]  }
 0x590   :  { %902 = dma.done.wait [#allocation3], 128  }
 0x591   :  { %903 = vsyncadd [#allocation3], 4294967168 }
 0x592   :  { %667 = vsyncpa [#allocation3], 1 }

</bundles_post_ra>
